<compile_context>
chip_gen: v7x
topology: tpu7x:2x2x1
jax: 0.10.0
libtpu: 0.0.40
codegen_flags: <defaults>
</compile_context>

<pallas_src>
import functools

import jax
import jax.numpy as jnp
from jax import lax
from jax.experimental import pallas as pl
from jax.experimental.pallas import tpu as pltpu


def _round_up(x: int, m: int) -> int:
    return ((x + m - 1) // m) * m


def _gather_block_kernel(ids_ref, table_hbm, out_ref, buf, sems, *, blk, inflight):
    # ids_ref  : SMEM (n_pad,) int32, scalar-prefetched flattened token ids
    # table_hbm: HBM ref (max_positions, emb_pad) -- never copied wholesale
    # out_ref  : VMEM (blk, emb_pad) output block
    # buf      : VMEM (blk, emb_pad) gather staging buffer
    # sems     : DMA semaphores (inflight,)
    base = pl.program_id(0) * blk

    def row_copy(r):
        tok = ids_ref[base + r]
        return pltpu.make_async_copy(
            table_hbm.at[pl.ds(tok, 1), :],
            buf.at[pl.ds(r, 1), :],
            sems.at[r % inflight],
        )

    # Prime the window with `inflight` outstanding row DMAs.
    prime = min(inflight, blk)
    for r in range(prime):          # static, tiny loop
        row_copy(r).start()

    def body(r, carry):
        row_copy(r).wait()          # row r landed in buf
        @pl.when(r + inflight < blk)
        def _():                    # slot just freed -> issue next row
            row_copy(r + inflight).start()
        return carry

    lax.fori_loop(0, blk, body, 0)

    # All blk rows are resident; emit one dense (blk, emb_pad) block store.
    out_ref[...] = buf[...]


def positional_encoding(tokens: jax.Array, emb_table: jax.Array,
                        *, tok_block: int = 256, inflight: int = 8) -> jax.Array:
    """Pallas equivalent of PositionalEncoding.forward(tokens)."""
    orig_shape = tokens.shape
    max_positions, emb_size = emb_table.shape
    dtype = emb_table.dtype
    itemsize = jnp.dtype(dtype).itemsize

    flat = tokens.reshape(-1).astype(jnp.int32)
    n_tokens = flat.shape[0]
    if n_tokens == 0:               # degenerate edge case: nothing to gather
        return jnp.zeros(orig_shape + (emb_size,), dtype)

    # Keep the row DMA in bounds (torch would raise instead; see TODO above).
    flat = jnp.clip(flat, 0, max_positions - 1)

    # Lane-dense embedding width so row DMAs / block stores are unmasked.
    emb_pad = _round_up(emb_size, 128)
    table = emb_table
    if emb_pad != emb_size:
        table = jnp.pad(emb_table, ((0, 0), (0, emb_pad - emb_size)))

    # Token block: multiple of 8, minimal padding waste, and >= 2 grid steps
    # whenever there are >= 16 tokens so both v7x TensorCores get work.
    n8 = _round_up(n_tokens, 8)
    n_blocks = max(pl.cdiv(n8, tok_block), 2 if n8 >= 16 else 1)
    blk = _round_up(pl.cdiv(n8, n_blocks), 8)
    n_blocks = pl.cdiv(n8, blk)
    n_pad = blk * n_blocks
    if n_pad != n_tokens:
        flat = jnp.pad(flat, (0, n_pad - n_tokens))   # pad with id 0 (valid)

    inflight = max(1, min(inflight, blk))

    kernel = functools.partial(_gather_block_kernel, blk=blk, inflight=inflight)

    # Pure data movement: no FLOPs, just table-row reads + output writes.
    cost = pl.CostEstimate(
        flops=0,
        transcendentals=0,
        bytes_accessed=(n_pad * emb_pad * itemsize      # gathered rows (read)
                        + n_pad * emb_pad * itemsize    # output (write)
                        + n_pad * 4),                   # token ids
    )

    out = pl.pallas_call(
        kernel,
        out_shape=jax.ShapeDtypeStruct((n_pad, emb_pad), dtype),
        grid_spec=pltpu.PrefetchScalarGridSpec(
            num_scalar_prefetch=1,                      # flat ids -> SMEM
            grid=(n_blocks,),
            in_specs=[pl.BlockSpec(memory_space=pl.ANY)],   # table stays in HBM
            out_specs=pl.BlockSpec((blk, emb_pad), lambda i, ids: (i, 0)),
            scratch_shapes=[
                pltpu.VMEM((blk, emb_pad), dtype),
                pltpu.SemaphoreType.DMA((inflight,)),
            ],
        ),
        compiler_params=pltpu.CompilerParams(
            dimension_semantics=("parallel",),
            vmem_limit_bytes=32 << 20,                  # far above actual use
        ),
        cost_estimate=cost,
    )(flat, table)

    out = out[:n_tokens, :emb_size]
    return out.reshape(orig_shape + (emb_size,))


if __name__ == "__main__":
    # Module hyper-parameters (small, consistent with the forward pass).
    max_positions = 64
    emb_size = 128
    batch, seq = 2, 8

    key = jax.random.PRNGKey(0)
    k_emb, k_tok = jax.random.split(key)

    # nn.Embedding default init: weight ~ N(0, 1).
    emb_table = jax.random.normal(
        k_emb, (max_positions, emb_size), dtype=jnp.float32
    )
    tokens = jax.random.randint(
        k_tok, (batch, seq), minval=0, maxval=max_positions, dtype=jnp.int32
    )

    out = positional_encoding(tokens, emb_table)
    out = jax.block_until_ready(out)

    # Reference check against plain JAX gather (== PyTorch embedding lookup).
    ref = emb_table[tokens]
    assert out.shape == (batch, seq, emb_size)
    assert jnp.array_equal(out, ref), "mismatch vs. reference gather"

    print("KERNEL_OK")
</pallas_src>

<mosaic_0001>
module attributes {stable_mosaic.version = 11 : i64} {
  func.func @_gather_block_kernel(%arg0: i32, %arg1: memref<16xi32, #tpu.memory_space<smem>>, %arg2: memref<64x128xf32, #tpu.memory_space<any>>, %arg3: memref<8x128xf32, #tpu.memory_space<vmem>>, %arg4: memref<8x128xf32, #tpu.memory_space<vmem>>, %arg5: memref<8x!tpu.dma_semaphore, #tpu.memory_space<semaphore_mem>>) attributes {dimension_semantics = [#tpu.dimension_semantics<parallel>], iteration_bounds = array<i64: 2>, scalar_prefetch = 1 : i64, scratch_operands = 2 : i64, tpu.core_type = #tpu.core_type<tc>, window_params = [{}, {transform_indices = @transform_1, window_bounds = array<i64: 8, 128>}]} {
    %c8_i32 = arith.constant 8 : i32
    %0 = arith.muli %arg0, %c8_i32 : i32
    %c0_i32 = arith.constant 0 : i32
    %1 = arith.addi %0, %c0_i32 : i32
    %2 = arith.index_cast %1 : i32 to index
    %3 = memref.load %arg1[%2] : memref<16xi32, #tpu.memory_space<smem>>
    %c0_i32_0 = arith.constant 0 : i32
    %c0_i32_1 = arith.constant 0 : i32
    %4 = tpu.memref_slice %arg2[%3, %c0_i32_1] : memref<64x128xf32, #tpu.memory_space<any>> -> memref<1x128xf32, #tpu.memory_space<any>>
    %c0_i32_2 = arith.constant 0 : i32
    %c0_i32_3 = arith.constant 0 : i32
    %5 = tpu.memref_slice %arg4[%c0_i32_2, %c0_i32_3] : memref<8x128xf32, #tpu.memory_space<vmem>> -> memref<1x128xf32, #tpu.memory_space<vmem>>
    %6 = tpu.memref_slice %arg5[%c0_i32_0] : memref<8x!tpu.dma_semaphore, #tpu.memory_space<semaphore_mem>> -> memref<1x!tpu.dma_semaphore, #tpu.memory_space<semaphore_mem>>
    %7 = tpu.memref_squeeze %6 : memref<1x!tpu.dma_semaphore, #tpu.memory_space<semaphore_mem>> -> memref<!tpu.dma_semaphore, #tpu.memory_space<semaphore_mem>>
    tpu.enqueue_dma source(%4 : memref<1x128xf32, #tpu.memory_space<any>>) target(%5 : memref<1x128xf32, #tpu.memory_space<vmem>>) target_semaphore(%7 : memref<!tpu.dma_semaphore, #tpu.memory_space<semaphore_mem>>)
    %c1_i32 = arith.constant 1 : i32
    %8 = arith.addi %0, %c1_i32 : i32
    %9 = arith.index_cast %8 : i32 to index
    %10 = memref.load %arg1[%9] : memref<16xi32, #tpu.memory_space<smem>>
    %c1_i32_4 = arith.constant 1 : i32
    %c0_i32_5 = arith.constant 0 : i32
    %11 = tpu.memref_slice %arg2[%10, %c0_i32_5] : memref<64x128xf32, #tpu.memory_space<any>> -> memref<1x128xf32, #tpu.memory_space<any>>
    %c1_i32_6 = arith.constant 1 : i32
    %c0_i32_7 = arith.constant 0 : i32
    %12 = tpu.memref_slice %arg4[%c1_i32_6, %c0_i32_7] : memref<8x128xf32, #tpu.memory_space<vmem>> -> memref<1x128xf32, #tpu.memory_space<vmem>>
    %13 = tpu.memref_slice %arg5[%c1_i32_4] : memref<8x!tpu.dma_semaphore, #tpu.memory_space<semaphore_mem>> -> memref<1x!tpu.dma_semaphore, #tpu.memory_space<semaphore_mem>>
    %14 = tpu.memref_squeeze %13 : memref<1x!tpu.dma_semaphore, #tpu.memory_space<semaphore_mem>> -> memref<!tpu.dma_semaphore, #tpu.memory_space<semaphore_mem>>
    tpu.enqueue_dma source(%11 : memref<1x128xf32, #tpu.memory_space<any>>) target(%12 : memref<1x128xf32, #tpu.memory_space<vmem>>) target_semaphore(%14 : memref<!tpu.dma_semaphore, #tpu.memory_space<semaphore_mem>>)
    %c2_i32 = arith.constant 2 : i32
    %15 = arith.addi %0, %c2_i32 : i32
    %16 = arith.index_cast %15 : i32 to index
    %17 = memref.load %arg1[%16] : memref<16xi32, #tpu.memory_space<smem>>
    %c2_i32_8 = arith.constant 2 : i32
    %c0_i32_9 = arith.constant 0 : i32
    %18 = tpu.memref_slice %arg2[%17, %c0_i32_9] : memref<64x128xf32, #tpu.memory_space<any>> -> memref<1x128xf32, #tpu.memory_space<any>>
    %c2_i32_10 = arith.constant 2 : i32
    %c0_i32_11 = arith.constant 0 : i32
    %19 = tpu.memref_slice %arg4[%c2_i32_10, %c0_i32_11] : memref<8x128xf32, #tpu.memory_space<vmem>> -> memref<1x128xf32, #tpu.memory_space<vmem>>
    %20 = tpu.memref_slice %arg5[%c2_i32_8] : memref<8x!tpu.dma_semaphore, #tpu.memory_space<semaphore_mem>> -> memref<1x!tpu.dma_semaphore, #tpu.memory_space<semaphore_mem>>
    %21 = tpu.memref_squeeze %20 : memref<1x!tpu.dma_semaphore, #tpu.memory_space<semaphore_mem>> -> memref<!tpu.dma_semaphore, #tpu.memory_space<semaphore_mem>>
    tpu.enqueue_dma source(%18 : memref<1x128xf32, #tpu.memory_space<any>>) target(%19 : memref<1x128xf32, #tpu.memory_space<vmem>>) target_semaphore(%21 : memref<!tpu.dma_semaphore, #tpu.memory_space<semaphore_mem>>)
    %c3_i32 = arith.constant 3 : i32
    %22 = arith.addi %0, %c3_i32 : i32
    %23 = arith.index_cast %22 : i32 to index
    %24 = memref.load %arg1[%23] : memref<16xi32, #tpu.memory_space<smem>>
    %c3_i32_12 = arith.constant 3 : i32
    %c0_i32_13 = arith.constant 0 : i32
    %25 = tpu.memref_slice %arg2[%24, %c0_i32_13] : memref<64x128xf32, #tpu.memory_space<any>> -> memref<1x128xf32, #tpu.memory_space<any>>
    %c3_i32_14 = arith.constant 3 : i32
    %c0_i32_15 = arith.constant 0 : i32
    %26 = tpu.memref_slice %arg4[%c3_i32_14, %c0_i32_15] : memref<8x128xf32, #tpu.memory_space<vmem>> -> memref<1x128xf32, #tpu.memory_space<vmem>>
    %27 = tpu.memref_slice %arg5[%c3_i32_12] : memref<8x!tpu.dma_semaphore, #tpu.memory_space<semaphore_mem>> -> memref<1x!tpu.dma_semaphore, #tpu.memory_space<semaphore_mem>>
    %28 = tpu.memref_squeeze %27 : memref<1x!tpu.dma_semaphore, #tpu.memory_space<semaphore_mem>> -> memref<!tpu.dma_semaphore, #tpu.memory_space<semaphore_mem>>
    tpu.enqueue_dma source(%25 : memref<1x128xf32, #tpu.memory_space<any>>) target(%26 : memref<1x128xf32, #tpu.memory_space<vmem>>) target_semaphore(%28 : memref<!tpu.dma_semaphore, #tpu.memory_space<semaphore_mem>>)
    %c4_i32 = arith.constant 4 : i32
    %29 = arith.addi %0, %c4_i32 : i32
    %30 = arith.index_cast %29 : i32 to index
    %31 = memref.load %arg1[%30] : memref<16xi32, #tpu.memory_space<smem>>
    %c4_i32_16 = arith.constant 4 : i32
    %c0_i32_17 = arith.constant 0 : i32
    %32 = tpu.memref_slice %arg2[%31, %c0_i32_17] : memref<64x128xf32, #tpu.memory_space<any>> -> memref<1x128xf32, #tpu.memory_space<any>>
    %c4_i32_18 = arith.constant 4 : i32
    %c0_i32_19 = arith.constant 0 : i32
    %33 = tpu.memref_slice %arg4[%c4_i32_18, %c0_i32_19] : memref<8x128xf32, #tpu.memory_space<vmem>> -> memref<1x128xf32, #tpu.memory_space<vmem>>
    %34 = tpu.memref_slice %arg5[%c4_i32_16] : memref<8x!tpu.dma_semaphore, #tpu.memory_space<semaphore_mem>> -> memref<1x!tpu.dma_semaphore, #tpu.memory_space<semaphore_mem>>
    %35 = tpu.memref_squeeze %34 : memref<1x!tpu.dma_semaphore, #tpu.memory_space<semaphore_mem>> -> memref<!tpu.dma_semaphore, #tpu.memory_space<semaphore_mem>>
    tpu.enqueue_dma source(%32 : memref<1x128xf32, #tpu.memory_space<any>>) target(%33 : memref<1x128xf32, #tpu.memory_space<vmem>>) target_semaphore(%35 : memref<!tpu.dma_semaphore, #tpu.memory_space<semaphore_mem>>)
    %c5_i32 = arith.constant 5 : i32
    %36 = arith.addi %0, %c5_i32 : i32
    %37 = arith.index_cast %36 : i32 to index
    %38 = memref.load %arg1[%37] : memref<16xi32, #tpu.memory_space<smem>>
    %c5_i32_20 = arith.constant 5 : i32
    %c0_i32_21 = arith.constant 0 : i32
    %39 = tpu.memref_slice %arg2[%38, %c0_i32_21] : memref<64x128xf32, #tpu.memory_space<any>> -> memref<1x128xf32, #tpu.memory_space<any>>
    %c5_i32_22 = arith.constant 5 : i32
    %c0_i32_23 = arith.constant 0 : i32
    %40 = tpu.memref_slice %arg4[%c5_i32_22, %c0_i32_23] : memref<8x128xf32, #tpu.memory_space<vmem>> -> memref<1x128xf32, #tpu.memory_space<vmem>>
    %41 = tpu.memref_slice %arg5[%c5_i32_20] : memref<8x!tpu.dma_semaphore, #tpu.memory_space<semaphore_mem>> -> memref<1x!tpu.dma_semaphore, #tpu.memory_space<semaphore_mem>>
    %42 = tpu.memref_squeeze %41 : memref<1x!tpu.dma_semaphore, #tpu.memory_space<semaphore_mem>> -> memref<!tpu.dma_semaphore, #tpu.memory_space<semaphore_mem>>
    tpu.enqueue_dma source(%39 : memref<1x128xf32, #tpu.memory_space<any>>) target(%40 : memref<1x128xf32, #tpu.memory_space<vmem>>) target_semaphore(%42 : memref<!tpu.dma_semaphore, #tpu.memory_space<semaphore_mem>>)
    %c6_i32 = arith.constant 6 : i32
    %43 = arith.addi %0, %c6_i32 : i32
    %44 = arith.index_cast %43 : i32 to index
    %45 = memref.load %arg1[%44] : memref<16xi32, #tpu.memory_space<smem>>
    %c6_i32_24 = arith.constant 6 : i32
    %c0_i32_25 = arith.constant 0 : i32
    %46 = tpu.memref_slice %arg2[%45, %c0_i32_25] : memref<64x128xf32, #tpu.memory_space<any>> -> memref<1x128xf32, #tpu.memory_space<any>>
    %c6_i32_26 = arith.constant 6 : i32
    %c0_i32_27 = arith.constant 0 : i32
    %47 = tpu.memref_slice %arg4[%c6_i32_26, %c0_i32_27] : memref<8x128xf32, #tpu.memory_space<vmem>> -> memref<1x128xf32, #tpu.memory_space<vmem>>
    %48 = tpu.memref_slice %arg5[%c6_i32_24] : memref<8x!tpu.dma_semaphore, #tpu.memory_space<semaphore_mem>> -> memref<1x!tpu.dma_semaphore, #tpu.memory_space<semaphore_mem>>
    %49 = tpu.memref_squeeze %48 : memref<1x!tpu.dma_semaphore, #tpu.memory_space<semaphore_mem>> -> memref<!tpu.dma_semaphore, #tpu.memory_space<semaphore_mem>>
    tpu.enqueue_dma source(%46 : memref<1x128xf32, #tpu.memory_space<any>>) target(%47 : memref<1x128xf32, #tpu.memory_space<vmem>>) target_semaphore(%49 : memref<!tpu.dma_semaphore, #tpu.memory_space<semaphore_mem>>)
    %c7_i32 = arith.constant 7 : i32
    %50 = arith.addi %0, %c7_i32 : i32
    %51 = arith.index_cast %50 : i32 to index
    %52 = memref.load %arg1[%51] : memref<16xi32, #tpu.memory_space<smem>>
    %c7_i32_28 = arith.constant 7 : i32
    %c0_i32_29 = arith.constant 0 : i32
    %53 = tpu.memref_slice %arg2[%52, %c0_i32_29] : memref<64x128xf32, #tpu.memory_space<any>> -> memref<1x128xf32, #tpu.memory_space<any>>
    %c7_i32_30 = arith.constant 7 : i32
    %c0_i32_31 = arith.constant 0 : i32
    %54 = tpu.memref_slice %arg4[%c7_i32_30, %c0_i32_31] : memref<8x128xf32, #tpu.memory_space<vmem>> -> memref<1x128xf32, #tpu.memory_space<vmem>>
    %55 = tpu.memref_slice %arg5[%c7_i32_28] : memref<8x!tpu.dma_semaphore, #tpu.memory_space<semaphore_mem>> -> memref<1x!tpu.dma_semaphore, #tpu.memory_space<semaphore_mem>>
    %56 = tpu.memref_squeeze %55 : memref<1x!tpu.dma_semaphore, #tpu.memory_space<semaphore_mem>> -> memref<!tpu.dma_semaphore, #tpu.memory_space<semaphore_mem>>
    tpu.enqueue_dma source(%53 : memref<1x128xf32, #tpu.memory_space<any>>) target(%54 : memref<1x128xf32, #tpu.memory_space<vmem>>) target_semaphore(%56 : memref<!tpu.dma_semaphore, #tpu.memory_space<semaphore_mem>>)
    %c0_i32_32 = arith.constant 0 : i32
    %c8_i32_33 = arith.constant 8 : i32
    %57 = arith.addi %c0_i32_32, %c8_i32_33 : i32
    %c1_i32_34 = arith.constant 1 : i32
    scf.for %arg6 = %c0_i32_32 to %57 step %c1_i32_34  : i32 {
      %60 = arith.addi %0, %arg6 : i32
      %61 = arith.index_cast %60 : i32 to index
      %62 = memref.load %arg1[%61] : memref<16xi32, #tpu.memory_space<smem>>
      %c8_i32_39 = arith.constant 8 : i32
      %c0_i32_40 = arith.constant 0 : i32
      %63 = arith.cmpi eq, %c8_i32_39, %c0_i32_40 : i32
      %c1_i32_41 = arith.constant 1 : i32
      %64 = arith.select %63, %c1_i32_41, %c8_i32_39 : i32
      %65 = arith.remsi %arg6, %64 : i32
      %c0_i32_42 = arith.constant 0 : i32
      %66 = arith.cmpi ne, %65, %c0_i32_42 : i32
      %c0_i32_43 = arith.constant 0 : i32
      %67 = arith.cmpi slt, %65, %c0_i32_43 : i32
      %c0_i32_44 = arith.constant 0 : i32
      %68 = arith.cmpi slt, %64, %c0_i32_44 : i32
      %69 = arith.xori %67, %68 : i1
      %70 = arith.andi %69, %66 : i1
      %71 = arith.addi %65, %64 : i32
      %72 = arith.select %70, %71, %65 : i32
      %c0_i32_45 = arith.constant 0 : i32
      %73 = tpu.memref_slice %arg2[%62, %c0_i32_45] : memref<64x128xf32, #tpu.memory_space<any>> -> memref<1x128xf32, #tpu.memory_space<any>>
      %c0_i32_46 = arith.constant 0 : i32
      %74 = tpu.memref_slice %arg4[%arg6, %c0_i32_46] : memref<8x128xf32, #tpu.memory_space<vmem>> -> memref<1x128xf32, #tpu.memory_space<vmem>>
      %75 = tpu.memref_slice %arg5[%72] : memref<8x!tpu.dma_semaphore, #tpu.memory_space<semaphore_mem>> -> memref<1x!tpu.dma_semaphore, #tpu.memory_space<semaphore_mem>>
      %76 = tpu.memref_squeeze %75 : memref<1x!tpu.dma_semaphore, #tpu.memory_space<semaphore_mem>> -> memref<!tpu.dma_semaphore, #tpu.memory_space<semaphore_mem>>
      tpu.wait_dma2 semaphore(%76 : memref<!tpu.dma_semaphore, #tpu.memory_space<semaphore_mem>>) src(%73 : memref<1x128xf32, #tpu.memory_space<any>>) dst(%74 : memref<1x128xf32, #tpu.memory_space<vmem>>)
      %c8_i32_47 = arith.constant 8 : i32
      %77 = arith.addi %arg6, %c8_i32_47 : i32
      %c8_i32_48 = arith.constant 8 : i32
      %78 = arith.cmpi slt, %77, %c8_i32_48 : i32
      %79 = arith.extui %78 : i1 to i32
      %c0_i32_49 = arith.constant 0 : i32
      %80 = arith.cmpi ne, %79, %c0_i32_49 : i32
      scf.if %80 {
        %c8_i32_50 = arith.constant 8 : i32
        %81 = arith.addi %arg6, %c8_i32_50 : i32
        %82 = arith.addi %0, %81 : i32
        %83 = arith.index_cast %82 : i32 to index
        %84 = memref.load %arg1[%83] : memref<16xi32, #tpu.memory_space<smem>>
        %c8_i32_51 = arith.constant 8 : i32
        %c0_i32_52 = arith.constant 0 : i32
        %85 = arith.cmpi eq, %c8_i32_51, %c0_i32_52 : i32
        %c1_i32_53 = arith.constant 1 : i32
        %86 = arith.select %85, %c1_i32_53, %c8_i32_51 : i32
        %87 = arith.remsi %81, %86 : i32
        %c0_i32_54 = arith.constant 0 : i32
        %88 = arith.cmpi ne, %87, %c0_i32_54 : i32
        %c0_i32_55 = arith.constant 0 : i32
        %89 = arith.cmpi slt, %87, %c0_i32_55 : i32
        %c0_i32_56 = arith.constant 0 : i32
        %90 = arith.cmpi slt, %86, %c0_i32_56 : i32
        %91 = arith.xori %89, %90 : i1
        %92 = arith.andi %91, %88 : i1
        %93 = arith.addi %87, %86 : i32
        %94 = arith.select %92, %93, %87 : i32
        %c0_i32_57 = arith.constant 0 : i32
        %95 = tpu.memref_slice %arg2[%84, %c0_i32_57] : memref<64x128xf32, #tpu.memory_space<any>> -> memref<1x128xf32, #tpu.memory_space<any>>
        %c0_i32_58 = arith.constant 0 : i32
        %96 = tpu.memref_slice %arg4[%81, %c0_i32_58] : memref<8x128xf32, #tpu.memory_space<vmem>> -> memref<1x128xf32, #tpu.memory_space<vmem>>
        %97 = tpu.memref_slice %arg5[%94] : memref<8x!tpu.dma_semaphore, #tpu.memory_space<semaphore_mem>> -> memref<1x!tpu.dma_semaphore, #tpu.memory_space<semaphore_mem>>
        %98 = tpu.memref_squeeze %97 : memref<1x!tpu.dma_semaphore, #tpu.memory_space<semaphore_mem>> -> memref<!tpu.dma_semaphore, #tpu.memory_space<semaphore_mem>>
        tpu.enqueue_dma source(%95 : memref<1x128xf32, #tpu.memory_space<any>>) target(%96 : memref<1x128xf32, #tpu.memory_space<vmem>>) target_semaphore(%98 : memref<!tpu.dma_semaphore, #tpu.memory_space<semaphore_mem>>)
      } else {
      }
    }
    %c8_i32_35 = arith.constant 8 : i32
    %c0 = arith.constant 0 : index
    %c0_36 = arith.constant 0 : index
    %58 = vector.load %arg4[%c0, %c0_36] : memref<8x128xf32, #tpu.memory_space<vmem>>, vector<8x128xf32>
    %c0_37 = arith.constant 0 : index
    %c0_38 = arith.constant 0 : index
    %59 = vector.load %arg3[%c0_37, %c0_38] : memref<8x128xf32, #tpu.memory_space<vmem>>, vector<8x128xf32>
    tpu.vector_store %arg3[%c0_37, %c0_38], %58 {strides = array<i32>} : memref<8x128xf32, #tpu.memory_space<vmem>>, vector<8x128xf32>,
    return
  }
  func.func @transform_1(%arg0: i32, %arg1: memref<16xi32, #tpu.memory_space<smem>>) -> (i32, i32) {
    %c0_i32 = arith.constant 0 : i32
    %c0_i32_0 = arith.constant 0 : i32
    return %arg0, %c0_i32 : i32, i32
  }
}

</mosaic_0001>

<bundles_post_ra>
// kernel: tpu_custom_call.1
= control target key start
LH: loop header
LB: loop body
LE: loop exit
PB: predicated region body
PF: predicated region fallthrough
CT: control target
= control target key end

     0   :  { %s1059_s0 = inlined_call_operand.hbm [shape: s32[16], index: 0, kind: input, shape index: {}]   ;;  %s1060_s1 = inlined_call_operand.hbm [shape: f32[64,128], index: 1, kind: input, shape index: {}]   ;;  %s1061_s2 = inlined_call_operand.hbm [shape: f32[16,128], index: 2, kind: output, shape index: {}]  }
   0x1   :  { %s471_s11 = scalar_lea.hbm %s1059_s0, 16 }
   0x2   :  { %p472_p0 = scmp.ne.s32.totalorder %s1059_s0, %s471_s11  ;;  %p475_p1 = scmp.lt.u32.totalorder %s471_s11, %s1059_s0 }
   0x4   :  { %p477_p2 = pnand %p475_p1, %p472_p0 }
   0x6   :  { %480 = shalt.err (!%p477_p2)  }
   0x7   :  { %s769_s16 = smov [#allocation5]  }
   0x8   :  { %8 = dma.hbm_to_smem %s1059_s0, 16, %s769_s16, [#allocation4] }
   0x9   :  { %745 = dma.done.wait [#allocation4], 16 }
   0xa   :  { %746 = vsyncadd [#allocation4], 4294967280 }
   0xb   :  { %10 = sfence }
   0xc   :  { %11 = vsyncpa [#allocation7], 0 }
   0xd   :  { %13 = vsyncpa [#allocation7 + $0x1], 0  ;;  %s806_s19 = smov 0   ;;  %s808_s20 = smov 0  }
   0xe   :  { %s810_s21 = smov 0  }
   0xf LB: > { %s385_s0 = sadd.s32 4294967295, %s763_s21   ;;  %s823_s22 = sadd.s32 1, %s763_s21   ;;  %s763_s21 = sphi %s810_s21, %s1076_s21   ;;  %s759_s20 = sphi %s808_s20, %s1075_s20   ;;  %s755_s19 = sphi %s806_s19, %s1074_s19  }
  0x10   : > { %s22_s23 = ssub.s32 %s763_s21, %s823_s22  ;;  %s25_s24 = sadd.s32 1, %s759_s20 }
  0x11   : > { %p23_p3 = scmp.eq.s32.totalorder %s22_s23, 0  ;;  %p386_p4 = scmp.ne.s32.totalorder %s22_s23, 0 }
  0x12   : > { %p29_p5 = scmp.eq.s32.totalorder %s763_s21, 1  ;;  %p34_p6 = scmp.ne.s32.totalorder %s759_s20, %s755_s19 }
  0x13   : > { %s832_s25 = scalar_select %p23_p3, %s759_s20, %s25_s24  }
  0x14   : > { %p834_p7 = por %p386_p4, %p29_p5  ;;  %p35_p8 = scmp.eq.s32.totalorder %s385_s0, 1 }
  0x15   : > { %p387_p10 = scmp.ge.s32.totalorder %s763_s21, 2 }
  0x16   : > { %s1065_s26 = scalar_select %p834_p7, 1, 0 }
  0x17   : > { %p838_p9 = por %p35_p8, %p34_p6  ;;  %44 = sbr.rel (%p387_p10) target bundleno = 289 (0x121), region = 12 }
  0x19   : > { %s1066_s27 = scalar_select %p838_p9, 1, 0 }
  0x1e   : > { %s1062_s28 = sand.u32 1, %s759_s20   ;;  %s845_s29 = sshll.u32 %s763_s21, 3 }
  0x1f   : > { %1067 = sst [smem:[#allocation32_spill]] %s845_s29  ;;  %s849_s30 = sshll.u32 %s1062_s28, 3 }
  0x20   : > { %s53_s3 = sld [smem:[#allocation5 + %s845_s29]]  ;;  %s770_s4 = smov [#allocation2]  }
  0x21   : > { %s63_s5 = sshll.u32 %s770_s4, 4  ;;  %s67_s6 = sadd.s32 1, %s845_s29  ;;  %s853_s5 = int_to_ptr.vmem [resolvable:$true] %s63_s5 }
  0x22   : > { %s855_s7 = sld [smem:[#allocation5 + %s67_s6]]  ;;  %s84_s8 = sadd.s32 2, %s845_s29 }
  0x23   : > { %s771_s9 = smov [#allocation2 + $0x1]   ;;  %s858_s11 = sld [smem:[#allocation5 + %s84_s8]] }
  0x24   : > { %s80_s10 = sshll.u32 %s771_s9, 4  ;;  %s868_s0 = scalar_lea.hbm %s1060_s1, 1024  ;;  %s860_s10 = int_to_ptr.vmem [resolvable:$true] %s80_s10 }
  0x26   : > { %s390_s12 = sshll.u32 %s53_s3, 4 }
  0x27   : > { %s55_s15 = scalar_lea.hbm %s1060_s1, %s390_s12 }
  0x28   : > { %s481_s16 = scalar_lea.hbm %s55_s15, 16  ;;  %p484_p12 = scmp.lt.u32.totalorder %s55_s15, %s1060_s1 }
  0x29   : > { %p482_p11 = scmp.ne.s32.totalorder %s55_s15, %s481_s16  ;;  %p485_p13 = scmp.lt.u32.totalorder %s868_s0, %s481_s16 }
  0x2a   : > { %p487_p1 = scmp.lt.u32.totalorder %s481_s16, %s55_s15 }
  0x2b   : > { %p486_p0 = por %p485_p13, %p484_p12 }
  0x2d   : > { %p488_p2 = por %p487_p1, %p486_p0 }
  0x2f   : > { %p489_p3 = pnand %p488_p2, %p482_p11 }
  0x31   : > { %492 = shalt.err (!%p489_p3)  }
  0x32   : > { %s493_s3 = scalar_lea.vmem %s853_s5, 16  ;;  %s877_s4 = scalar_lea.vmem %s853_s5, 128 }
  0x33   : > { %p494_p4 = scmp.ne.s32.totalorder %s853_s5, %s493_s3  ;;  %p498_p5 = scmp.lt.s32.totalorder %s853_s5, %s853_s5 }
  0x34   : > { %p499_p6 = scmp.lt.s32.totalorder %s877_s4, %s493_s3 }
  0x36   : > { %p500_p8 = por %p499_p6, %p498_p5 }
  0x38   : > { %p501_p10 = pnand %p500_p8, %p494_p4 }
  0x3a   : > { %504 = shalt.err (!%p501_p10)  }
  0x3b   : > { %66 = dma.hbm_to_vmem [thread:$0]  %s55_s15, 16, %s853_s5, [#allocation3] }
  0x3c   : > { %s391_s6 = sshll.u32 %s855_s7, 4  ;;  %s772_s8 = smov [#allocation2 + $0x2]  }
  0x3d   : > { %s97_s9 = sshll.u32 %s772_s8, 4  ;;  %s70_s14 = scalar_lea.hbm %s1060_s1, %s391_s6  ;;  %s887_s9 = int_to_ptr.vmem [resolvable:$true] %s97_s9 }
  0x3e   : > { %s505_s16 = scalar_lea.hbm %s70_s14, 16  ;;  %p508_p12 = scmp.lt.u32.totalorder %s70_s14, %s1060_s1 }
  0x3f   : > { %p506_p11 = scmp.ne.s32.totalorder %s70_s14, %s505_s16  ;;  %p509_p13 = scmp.lt.u32.totalorder %s868_s0, %s505_s16 }
  0x40   : > { %p511_p1 = scmp.lt.u32.totalorder %s505_s16, %s70_s14 }
  0x41   : > { %p510_p0 = por %p509_p13, %p508_p12 }
  0x43   : > { %p512_p2 = por %p511_p1, %p510_p0 }
  0x45   : > { %p513_p3 = pnand %p512_p2, %p506_p11 }
  0x47   : > { %516 = shalt.err (!%p513_p3)  }
  0x48   : > { %s517_s7 = scalar_lea.vmem %s860_s10, 16  ;;  %p522_p5 = scmp.lt.s32.totalorder %s860_s10, %s853_s5 }
  0x49   : > { %p518_p4 = scmp.ne.s32.totalorder %s860_s10, %s517_s7  ;;  %p523_p6 = scmp.lt.s32.totalorder %s877_s4, %s517_s7 }
  0x4b   : > { %p524_p8 = por %p523_p6, %p522_p5 }
  0x4d   : > { %p525_p10 = pnand %p524_p8, %p518_p4 }
  0x4f   : > { %528 = shalt.err (!%p525_p10)  }
  0x50   : > { %83 = dma.hbm_to_vmem [thread:$0]  %s70_s14, 16, %s860_s10, [#allocation3 + $0x1] }
  0x51   : > { %s392_s15 = sshll.u32 %s858_s11, 4  ;;  %s101_s23 = sadd.s32 3, %s845_s29 }
  0x52   : > { %s87_s6 = scalar_lea.hbm %s1060_s1, %s392_s15  ;;  %s904_s8 = sld [smem:[#allocation5 + %s101_s23]] }
  0x53   : > { %s529_s12 = scalar_lea.hbm %s87_s6, 16  ;;  %p532_p12 = scmp.lt.u32.totalorder %s87_s6, %s1060_s1 }
  0x54   : > { %p530_p11 = scmp.ne.s32.totalorder %s87_s6, %s529_s12  ;;  %p533_p13 = scmp.lt.u32.totalorder %s868_s0, %s529_s12 }
  0x55   : > { %p535_p1 = scmp.lt.u32.totalorder %s529_s12, %s87_s6 }
  0x56   : > { %p534_p0 = por %p533_p13, %p532_p12 }
  0x58   : > { %p536_p2 = por %p535_p1, %p534_p0 }
  0x5a   : > { %p537_p3 = pnand %p536_p2, %p530_p11 }
  0x5c   : > { %540 = shalt.err (!%p537_p3)  }
  0x5d   : > { %s541_s10 = scalar_lea.vmem %s887_s9, 16  ;;  %p546_p5 = scmp.lt.s32.totalorder %s887_s9, %s853_s5 }
  0x5e   : > { %p542_p4 = scmp.ne.s32.totalorder %s887_s9, %s541_s10  ;;  %p547_p6 = scmp.lt.s32.totalorder %s877_s4, %s541_s10 }
  0x60   : > { %p548_p8 = por %p547_p6, %p546_p5 }
  0x62   : > { %p549_p10 = pnand %p548_p8, %p542_p4 }
  0x64   : > { %552 = shalt.err (!%p549_p10)  }
  0x65   : > { %100 = dma.hbm_to_vmem [thread:$0]  %s87_s6, 16, %s887_s9, [#allocation3 + $0x2] }
  0x66   : > { %s118_s11 = sadd.s32 4, %s845_s29  ;;  %s773_s14 = smov [#allocation2 + $0x3]  }
  0x67   : > { %s114_s17 = sshll.u32 %s773_s14, 4  ;;  %s119_s18 = sld [smem:[#allocation5 + %s118_s11]]  ;;  %s115_s17 = int_to_ptr.vmem [resolvable:$true] %s114_s17 }
  0x68   : > { %s774_s7 = smov [#allocation2 + $0x4]   ;;  %s135_s23 = sadd.s32 5, %s845_s29 }
  0x69   : > { %s131_s15 = sshll.u32 %s774_s7, 4  ;;  %s393_s24 = sshll.u32 %s904_s8, 4  ;;  %s919_s15 = int_to_ptr.vmem [resolvable:$true] %s131_s15 }
  0x6a   : > { %s104_s13 = scalar_lea.hbm %s1060_s1, %s393_s24  ;;  %s924_s16 = sld [smem:[#allocation5 + %s135_s23]] }
  0x6b   : > { %s553_s10 = scalar_lea.hbm %s104_s13, 16  ;;  %p556_p12 = scmp.lt.u32.totalorder %s104_s13, %s1060_s1 }
  0x6c   : > { %p554_p11 = scmp.ne.s32.totalorder %s104_s13, %s553_s10  ;;  %p557_p13 = scmp.lt.u32.totalorder %s868_s0, %s553_s10 }
  0x6d   : > { %p559_p1 = scmp.lt.u32.totalorder %s553_s10, %s104_s13 }
  0x6e   : > { %p558_p0 = por %p557_p13, %p556_p12 }
  0x70   : > { %p560_p2 = por %p559_p1, %p558_p0 }
  0x72   : > { %p561_p3 = pnand %p560_p2, %p554_p11 }
  0x74   : > { %564 = shalt.err (!%p561_p3)  }
  0x75   : > { %s565_s8 = scalar_lea.vmem %s115_s17, 16  ;;  %p570_p5 = scmp.lt.s32.totalorder %s115_s17, %s853_s5 }
  0x76   : > { %p566_p4 = scmp.ne.s32.totalorder %s115_s17, %s565_s8  ;;  %p571_p6 = scmp.lt.s32.totalorder %s877_s4, %s565_s8 }
  0x78   : > { %p572_p8 = por %p571_p6, %p570_p5 }
  0x7a   : > { %p573_p10 = pnand %p572_p8, %p566_p4 }
  0x7c   : > { %576 = shalt.err (!%p573_p10)  }
  0x7d   : > { %117 = dma.hbm_to_vmem [thread:$0]  %s104_s13, 16, %s115_s17, [#allocation3 + $0x3] }
  0x7e   : > { %s394_s11 = sshll.u32 %s119_s18, 4  ;;  %s775_s24 = smov [#allocation2 + $0x5]  }
  0x7f   : > { %s121_s23 = scalar_lea.hbm %s1060_s1, %s394_s11  ;;  %s148_s3 = sshll.u32 %s775_s24, 4  ;;  %s149_s3 = int_to_ptr.vmem [resolvable:$true] %s148_s3 }
  0x80   : > { %s577_s12 = scalar_lea.hbm %s121_s23, 16  ;;  %p580_p12 = scmp.lt.u32.totalorder %s121_s23, %s1060_s1 }
  0x81   : > { %p578_p11 = scmp.ne.s32.totalorder %s121_s23, %s577_s12  ;;  %p581_p13 = scmp.lt.u32.totalorder %s868_s0, %s577_s12 }
  0x82   : > { %p583_p1 = scmp.lt.u32.totalorder %s577_s12, %s121_s23 }
  0x83   : > { %p582_p0 = por %p581_p13, %p580_p12 }
  0x85   : > { %p584_p2 = por %p583_p1, %p582_p0 }
  0x87   : > { %p585_p3 = pnand %p584_p2, %p578_p11 }
  0x89   : > { %588 = shalt.err (!%p585_p3)  }
  0x8a   : > { %s589_s17 = scalar_lea.vmem %s919_s15, 16  ;;  %p594_p5 = scmp.lt.s32.totalorder %s919_s15, %s853_s5 }
  0x8b   : > { %p590_p4 = scmp.ne.s32.totalorder %s919_s15, %s589_s17  ;;  %p595_p6 = scmp.lt.s32.totalorder %s877_s4, %s589_s17 }
  0x8d   : > { %p596_p8 = por %p595_p6, %p594_p5 }
  0x8f   : > { %p597_p10 = pnand %p596_p8, %p590_p4 }
  0x91   : > { %600 = shalt.err (!%p597_p10)  }
  0x92   : > { %134 = dma.hbm_to_vmem [thread:$0]  %s121_s23, 16, %s919_s15, [#allocation3 + $0x4] }
  0x93   : > { %s152_s18 = sadd.s32 6, %s845_s29  ;;  %s395_s13 = sshll.u32 %s924_s16, 4 }
  0x94   : > { %s153_s6 = sld [smem:[#allocation5 + %s152_s18]]  ;;  %s138_s14 = scalar_lea.hbm %s1060_s1, %s395_s13 }
  0x95   : > { %s601_s7 = scalar_lea.hbm %s138_s14, 16  ;;  %p604_p12 = scmp.lt.u32.totalorder %s138_s14, %s1060_s1 }
  0x96   : > { %p602_p11 = scmp.ne.s32.totalorder %s138_s14, %s601_s7  ;;  %p605_p13 = scmp.lt.u32.totalorder %s868_s0, %s601_s7 }
  0x97   : > { %p607_p1 = scmp.lt.u32.totalorder %s601_s7, %s138_s14 }
  0x98   : > { %p606_p0 = por %p605_p13, %p604_p12 }
  0x9a   : > { %p608_p2 = por %p607_p1, %p606_p0 }
  0x9c   : > { %p609_p3 = pnand %p608_p2, %p602_p11 }
  0x9e   : > { %612 = shalt.err (!%p609_p3)  }
  0x9f   : > { %s613_s15 = scalar_lea.vmem %s149_s3, 16  ;;  %p618_p5 = scmp.lt.s32.totalorder %s149_s3, %s853_s5 }
  0xa0   : > { %p614_p4 = scmp.ne.s32.totalorder %s149_s3, %s613_s15  ;;  %p619_p6 = scmp.lt.s32.totalorder %s877_s4, %s613_s15 }
  0xa2   : > { %p620_p8 = por %p619_p6, %p618_p5 }
  0xa4   : > { %p621_p10 = pnand %p620_p8, %p614_p4 }
  0xa6   : > { %624 = shalt.err (!%p621_p10)  }
  0xa7   : > { %151 = dma.hbm_to_vmem [thread:$0]  %s138_s14, 16, %s149_s3, [#allocation3 + $0x5] }
  0xa8   : > { %s776_s16 = smov [#allocation2 + $0x6]   ;;  %s169_s10 = sadd.s32 7, %s845_s29 }
  0xa9   : > { %s165_s23 = sshll.u32 %s776_s16, 4  ;;  %s170_s9 = sld [smem:[#allocation5 + %s169_s10]]  ;;  %s166_s23 = int_to_ptr.vmem [resolvable:$true] %s165_s23 }
  0xaa   : > { %s396_s17 = sshll.u32 %s153_s6, 4  ;;  %s777_s18 = smov [#allocation2 + $0x7]  }
  0xab   : > { %s182_s13 = sshll.u32 %s777_s18, 4  ;;  %s155_s7 = scalar_lea.hbm %s1060_s1, %s396_s17  ;;  %s183_s13 = int_to_ptr.vmem [resolvable:$true] %s182_s13 }
  0xac   : > { %s625_s24 = scalar_lea.hbm %s155_s7, 16  ;;  %p628_p12 = scmp.lt.u32.totalorder %s155_s7, %s1060_s1 }
  0xad   : > { %p626_p11 = scmp.ne.s32.totalorder %s155_s7, %s625_s24  ;;  %p629_p13 = scmp.lt.u32.totalorder %s868_s0, %s625_s24 }
  0xae   : > { %p631_p1 = scmp.lt.u32.totalorder %s625_s24, %s155_s7 }
  0xaf   : > { %p630_p0 = por %p629_p13, %p628_p12 }
  0xb1   : > { %p632_p2 = por %p631_p1, %p630_p0 }
  0xb3   : > { %p633_p3 = pnand %p632_p2, %p626_p11 }
  0xb5   : > { %636 = shalt.err (!%p633_p3)  }
  0xb6   : > { %s637_s3 = scalar_lea.vmem %s166_s23, 16  ;;  %p642_p5 = scmp.lt.s32.totalorder %s166_s23, %s853_s5 }
  0xb7   : > { %p638_p4 = scmp.ne.s32.totalorder %s166_s23, %s637_s3  ;;  %p643_p6 = scmp.lt.s32.totalorder %s877_s4, %s637_s3 }
  0xb9   : > { %p644_p8 = por %p643_p6, %p642_p5 }
  0xbb   : > { %p645_p10 = pnand %p644_p8, %p638_p4 }
  0xbd   : > { %648 = shalt.err (!%p645_p10)  }
  0xbe   : > { %168 = dma.hbm_to_vmem [thread:$0]  %s155_s7, 16, %s166_s23, [#allocation3 + $0x6] }
  0xbf   : > { %s397_s6 = sshll.u32 %s170_s9, 4 }
  0xc0   : > { %s172_s10 = scalar_lea.hbm %s1060_s1, %s397_s6 }
  0xc1   : > { %s649_s17 = scalar_lea.hbm %s172_s10, 16  ;;  %p652_p12 = scmp.lt.u32.totalorder %s172_s10, %s1060_s1 }
  0xc2   : > { %p650_p11 = scmp.ne.s32.totalorder %s172_s10, %s649_s17  ;;  %p653_p13 = scmp.lt.u32.totalorder %s868_s0, %s649_s17 }
  0xc3   : > { %p655_p1 = scmp.lt.u32.totalorder %s649_s17, %s172_s10 }
  0xc4   : > { %p654_p0 = por %p653_p13, %p652_p12 }
  0xc6   : > { %p656_p2 = por %p655_p1, %p654_p0 }
  0xc8   : > { %p657_p3 = pnand %p656_p2, %p650_p11 }
  0xca   : > { %660 = shalt.err (!%p657_p3)  }
  0xcb   : > { %s661_s23 = scalar_lea.vmem %s183_s13, 16  ;;  %p666_p5 = scmp.lt.s32.totalorder %s183_s13, %s853_s5 }
  0xcc   : > { %p662_p4 = scmp.ne.s32.totalorder %s183_s13, %s661_s23  ;;  %p667_p6 = scmp.lt.s32.totalorder %s877_s4, %s661_s23 }
  0xce   : > { %p668_p8 = por %p667_p6, %p666_p5 }
  0xd0   : > { %p669_p10 = pnand %p668_p8, %p662_p4 }
  0xd2   : > { %672 = shalt.err (!%p669_p10)  }
  0xd3   : > { %185 = dma.hbm_to_vmem [thread:$0]  %s172_s10, 16, %s183_s13, [#allocation3 + $0x7] }
  0xd4   : > { %s976_s11 = smov 0  }
  0xd5 LB: >> { %p194_p11 = scmp.lt.s32.totalorder %s767_s11, 0  ;;  %s195_s7 = ssub.s32 0, %s767_s11  ;;  %s767_s11 = sphi %s976_s11, %s191_s11  }
  0xd6   : >> { %s398_s24 = smin.u32 %s767_s11, %s195_s7 }
  0xd7   : >> { %s197_s12 = sand.u32 7, %s398_s24  }
  0xd8   : >> { %s198_s15 = ssub.s32 0, %s197_s12 }
  0xd9   : >> { %s1078_s15 = smov (!%p194_p11, %s198_s15), %s197_s12 }
  0xda   : >> { %p400_p12 = scmp.lt.s32.totalorder %s1078_s15, 0  ;;  %s204_s13 = sadd.s32 8, %s1078_s15 }
  0xdc   : >> { %s1080_s13 = smov (!%p400_p12, %s204_s13), %s1078_s15 }
  0xdd   : >> { %s206_s3 = scalar_lea.sflag [#allocation3], %s1080_s13 }
  0xde   : >> { %747 = dma.done.wait %s206_s3, 16 }
  0xdf   : >> { %748 = vsyncadd %s206_s3, 4294967280  ;;  %s1068_s29 = sld [smem:[#allocation32_spill]]  ;;  %s985_s6 = sadd.s32 8, %s767_s11 }
  0xe0   : >> { %p428_p13 = scmp.lt.s32.totalorder %s985_s6, 8  ;;  %p217_p0 = scmp.lt.s32.totalorder %s985_s6, 0 }
  0xe1   : >> { %s218_s10 = ssub.s32 0, %s985_s6  ;;  %s358_s23 = scalar_lea.vmem [#allocation2], %s767_s11 }
  0xe2   : >> { %s419_s16 = scalar_select %p428_p13, [#allocation5], [#allocation28] }
  0xe3   : >> { %s402_s18 = smin.u32 %s218_s10, %s985_s6  ;;  %s359_s7 = scalar_lea.vmem %s358_s23, 8 [#allocation2] }
  0xe4   : >> { %s220_s8 = sand.u32 7, %s402_s18   ;;  %s240_s12 = sshll.u32 %s359_s7, 4  ;;  %s241_s12 = int_to_ptr.vmem [resolvable:$true] %s240_s12 }
  0xe5   : >> { %s215_s14 = sadd.s32 %s1068_s29, %s985_s6  ;;  %s221_s24 = ssub.s32 0, %s220_s8 }
  0xe6   : >> { %s1082_s14 = smov (!%p428_p13, %s215_s14), 0  ;;  %s1084_s24 = smov (!%p217_p0, %s221_s24), %s220_s8 }
  0xe7   : >> { %s216_s17 = sld [smem:[%s419_s16 + %s1082_s14]]  ;;  %p404_p1 = scmp.lt.s32.totalorder %s1084_s24, 0 }
  0xe8   : >> { %s227_s15 = sadd.s32 8, %s1084_s24 }
  0xe9   : >> { %s1086_s15 = smov (!%p404_p1, %s227_s15), %s1084_s24 }
  0xea   : >> { %s232_s29 = scalar_lea.sflag [#allocation3], %s1086_s15 }
  0xed   : >> { %s405_s13 = sshll.u32 %s216_s17, 4 }
  0xee   : >> { %s230_s9 = scalar_lea.hbm %s1060_s1, %s405_s13 }
  0xef   : >> { %s673_s14 = scalar_lea.hbm %s230_s9, 16  ;;  %p678_p5 = scmp.lt.u32.totalorder %s230_s9, %s1060_s1 }
  0xf0   : >> { %p674_p2 = scmp.ne.s32.totalorder %s230_s9, %s673_s14  ;;  %p679_p6 = scmp.lt.u32.totalorder %s868_s0, %s673_s14 }
  0xf1   : >> { %p681_p10 = scmp.lt.u32.totalorder %s673_s14, %s230_s9 }
  0xf2   : >> { %p675_p3 = pnand %p674_p2, %p428_p13  ;;  %p680_p8 = por %p679_p6, %p678_p5 }
  0xf4   : >> { %p676_p4 = pneg %p675_p3  ;;  %p682_p11 = por %p681_p10, %p680_p8 }
  0xf6   : >> { %p683_p12 = pnand %p682_p11, %p676_p4 }
  0xf8   : >> { %686 = shalt.err (!%p683_p12)  }
  0xf9   : >> { %s687_s28 = scalar_lea.vmem %s241_s12, 16  ;;  %p694_p2 = scmp.lt.s32.totalorder %s241_s12, %s853_s5 }
  0xfa   : >> { %p688_p0 = scmp.ne.s32.totalorder %s241_s12, %s687_s28  ;;  %p695_p3 = scmp.lt.s32.totalorder %s877_s4, %s687_s28 }
  0xfc   : >> { %p689_p1 = pnand %p688_p0, %p428_p13  ;;  %p696_p7 = por %p695_p3, %p694_p2 }
  0xfe   : >> { %p690_p9 = pneg %p689_p1 }
 0x100   : >> { %p697_p5 = pnand %p696_p7, %p690_p9 }
 0x102   : >> { %700 = shalt.err (!%p697_p5)  }
 0x103   : >> { %421 = dma.hbm_to_vmem [thread:$0]  (%p428_p13), %s230_s9, 16, %s241_s12, %s232_s29 }
 0x104   : >> { %s191_s11 = sadd.s32 1, %s767_s11  }
 0x105   : >> { %p188_p4 = scmp.ge.s32.totalorder %s191_s11, 8  }
 0x106   : > { %v244_v0 = vld [vmem:[#allocation2] sm:$0xff] (%p188_p4)  ;;  %s407_s17 = sshll.u32 (%p188_p4), %s763_s21, 7  ;;  %s1069_s18 = scalar_lea.vmem (%p188_p4), [#allocation6], %s849_s30 }
 0x107   : > { %190 = sbr.rel (!%p188_p4) target bundleno = 213 (0xd5), region = 124  ;;  %245 = vst [vmem:[%s1069_s18] sm:$0xff] (%p188_p4), %v244_v0  ;;  %s1022_s6 = scalar_lea.hbm (%p188_p4), %s1061_s2, %s407_s17 }
 0x108   : > { %s1070_s29 = smov (%p188_p4), %s1069_s18  ;;  %s1071_s7 = sand.u32 (%p188_p4), 1, %s759_s20  }
 0x109   : > { %s260_s9 = sshll.u32 (%p188_p4), %s1070_s29, 4  ;;  %s247_s11 = scalar_lea.sflag (%p188_p4), [#allocation7], %s1071_s7  ;;  %s261_s9 = int_to_ptr.vmem [resolvable:$true] %s260_s9 }
 0x10a   : > { %s701_s24 = scalar_lea.vmem (%p188_p4), %s261_s9, 128  ;;  %p1072_p9 = scmp.ne.s32.totalorder (%p188_p4), %s1065_s26, 0 }
 0x10b   : > { %p702_p7 = scmp.ne.s32.totalorder (%p188_p4), %s261_s9, %s701_s24  ;;  %s778_s5 = smov (%p188_p4), [#allocation6]  }
 0x10c   : > { %s705_s0 = sshll.u32 (%p188_p4), %s778_s5, 4  ;;  %s706_s0 = int_to_ptr.vmem [resolvable:$false] %s705_s0 }
 0x10d   : > { %p703_p13 = pnand (%p188_p4), %p702_p7, %p1072_p9  ;;  %s707_s4 = scalar_lea.vmem (%p188_p4), %s706_s0, 256 }
 0x10e   : > { %p708_p8 = scmp.lt.s32.totalorder %s261_s9, %s706_s0  ;;  %p709_p10 = scmp.lt.s32.totalorder %s707_s4, %s701_s24 }
 0x10f   : > { %p704_p6 = pneg %p703_p13 }
 0x110   : > { %p710_p11 = por %p709_p10, %p708_p8 }
 0x112   : > { %p711_p12 = pnand %p710_p11, %p704_p6 }
 0x114   : > { %714 = shalt.err (!%p711_p12)
}
 0x115   : > { %s715_s30 = scalar_lea.hbm %s1022_s6, 128  ;;  %s719_s13 = scalar_lea.hbm %s1061_s2, 256 }
 0x116   : > { %p716_p0 = scmp.ne.s32.totalorder %s1022_s6, %s715_s30  ;;  %p720_p3 = scmp.lt.u32.totalorder %s1022_s6, %s1061_s2 }
 0x117   : > { %p721_p5 = scmp.lt.u32.totalorder %s719_s13, %s715_s30  ;;  %p723_p7 = scmp.lt.u32.totalorder %s715_s30, %s1022_s6 }
 0x118   : > { %p717_p1 = pnand %p716_p0, %p1072_p9 }
 0x119   : > { %p722_p4 = por %p721_p5, %p720_p3 }
 0x11a   : > { %p718_p2 = pneg %p717_p1 }
 0x11b   : > { %p724_p13 = por %p723_p7, %p722_p4 }
 0x11d   : > { %p725_p6 = pnand %p724_p13, %p718_p2 }
 0x11f   : > { %728 = shalt.err (!%p725_p6)
}
 0x120   : > { %422 = dma.vmem_to_hbm [thread:$0]  (%p1072_p9), %s261_s9, 128, %s1022_s6, %s247_s11  }
 0x121 PF: > { %p429_p8 = scmp.ge.s32.totalorder %s763_s21, 1  ;;  %s272_s16 = sand.u32 1, %s755_s19  }
 0x122   : > { %p1073_p10 = scmp.ne.s32.totalorder %s1066_s27, 0  ;;  %s273_s10 = scalar_lea.sflag [#allocation7], %s272_s16 }
 0x124   : > { %p425_p11 = pnand %p429_p8, %p1073_p10 }
 0x126   : > { %750 = dma.done.wait (!%p425_p11), %s273_s10, 128  }
 0x127   : > { %752 = vsyncadd (!%p425_p11), %s273_s10, 4294967168  ;;  %p16_p12 = scmp.ge.s32.totalorder %s823_s22, 3   ;;  %s1074_s19 = smov %s759_s20 }
 0x128   : > { %s1075_s20 = smov %s832_s25  ;;  %s1076_s21 = smov %s823_s22 }
 0x129   :  { %18 = sbr.rel (!%p16_p12) target bundleno = 15 (0xf), region = 135 }
 0x130   :  { %278 = vsyncpa [#allocation7], 1 }
 0x131   :  { %280 = vsyncpa [#allocation7 + $0x1], 1 }
 0x132   :  { %281 = vsyncmov [#allocation3] }
 0x135   :  { %s282_s21 = vpop.sfrf %281 }
 0x136   :  { %p410_p9 = scmp.ne.s32.totalorder %s282_s21, 0 }
 0x138   :  { %286 = shalt.err (%p410_p9)  }
 0x139   :  { %288 = vsyncmov [#allocation3 + $0x1] }
 0x13c   :  { %s289_s26 = vpop.sfrf %288 }
 0x13d   :  { %p411_p0 = scmp.ne.s32.totalorder %s289_s26, 0 }
 0x13f   :  { %293 = shalt.err (%p411_p0)  }
 0x140   :  { %295 = vsyncmov [#allocation3 + $0x2] }
 0x143   :  { %s296_s27 = vpop.sfrf %295 }
 0x144   :  { %p412_p1 = scmp.ne.s32.totalorder %s296_s27, 0 }
 0x146   :  { %300 = shalt.err (%p412_p1)  }
 0x147   :  { %302 = vsyncmov [#allocation3 + $0x3] }
 0x14a   :  { %s303_s28 = vpop.sfrf %302 }
 0x14b   :  { %p413_p2 = scmp.ne.s32.totalorder %s303_s28, 0 }
 0x14d   :  { %307 = shalt.err (%p413_p2)  }
 0x14e   :  { %309 = vsyncmov [#allocation3 + $0x4] }
 0x151   :  { %s310_s22 = vpop.sfrf %309 }
 0x152   :  { %p414_p3 = scmp.ne.s32.totalorder %s310_s22, 0 }
 0x154   :  { %314 = shalt.err (%p414_p3)  }
 0x155   :  { %316 = vsyncmov [#allocation3 + $0x5] }
 0x158   :  { %s317_s1 = vpop.sfrf %316 }
 0x159   :  { %p415_p5 = scmp.ne.s32.totalorder %s317_s1, 0 }
 0x15b   :  { %321 = shalt.err (%p415_p5)  }
 0x15c   :  { %323 = vsyncmov [#allocation3 + $0x6] }
 0x15f   :  { %s324_s2 = vpop.sfrf %323 }
 0x160   :  { %p416_p4 = scmp.ne.s32.totalorder %s324_s2, 0 }
 0x162   :  { %328 = shalt.err (%p416_p4)  }
 0x163   :  { %330 = vsyncmov [#allocation3 + $0x7] }
 0x166   :  { %s331_s19 = vpop.sfrf %330 }
 0x167   :  { %p417_p7 = scmp.ne.s32.totalorder %s331_s19, 0 }
 0x169   :  { %335 = shalt.err (%p417_p7)  }

</bundles_post_ra>
